<compile_context>
chip_gen: v5e
topology: v5e:2x2
jax: 0.10.0
libtpu: 0.0.40
codegen_flags: <defaults>
</compile_context>

<pallas_src>
import jax
import jax.numpy as jnp
from jax import lax
from jax.experimental import pallas as pl
from jax.experimental.pallas import tpu as pltpu

# ----------------------------- configuration -------------------------------
B = 2                         # args.batch_size
IN_CHANS = 2                  # args.in_chans
INPUT_SIZE = (8, 8, 8)        # args.input_size
PATCH_SIZE = (4, 4, 4)        # args.patch_size
GRID_SIZE = tuple(s // p for s, p in zip(INPUT_SIZE, PATCH_SIZE))
L = GRID_SIZE[0] * GRID_SIZE[1] * GRID_SIZE[2]                        # 8 tokens
OUT_CHANS = IN_CHANS * PATCH_SIZE[0] * PATCH_SIZE[1] * PATCH_SIZE[2]  # 128
ENC_DIM = 96                  # args.encoder_embed_dim (divisible by 6)
D_PAD = 128                   # lane-padded encoder dim (zero-padded 96 -> 128)
MLP_DIM = 128                 # predictor hidden dim
TEMP = 0.2                    # args.T
BN_EPS = 1e-5
TWO_B = 2 * B


# ------------------------------ JAX glue ------------------------------------
def patchify_image(x, patch_size):
    """x: (B, C, H, W, D) -> (B, L, prod(patch)*C), last axis order [ph,pw,pd,c]."""
    b, c, h, w, d = x.shape
    ph, pw, pd = patch_size
    gh, gw, gd = h // ph, w // pw, d // pd
    x = x.reshape(b, c, gh, ph, gw, pw, gd, pd)
    x = x.transpose(0, 2, 4, 6, 3, 5, 7, 1)
    return x.reshape(b, gh * gw * gd, ph * pw * pd * c)


def build_3d_sincos_position_embedding(grid_size, embed_dim, temperature=10000.0):
    h, w, d = grid_size
    gh, gw, gd = jnp.meshgrid(
        jnp.arange(h, dtype=jnp.float32),
        jnp.arange(w, dtype=jnp.float32),
        jnp.arange(d, dtype=jnp.float32),
        indexing="ij",
    )
    assert embed_dim % 6 == 0
    pos_dim = embed_dim // 6
    omega = jnp.arange(pos_dim, dtype=jnp.float32) / pos_dim
    omega = 1.0 / temperature ** omega
    out_h = jnp.einsum("m,d->md", gh.flatten(), omega)
    out_w = jnp.einsum("m,d->md", gw.flatten(), omega)
    out_d = jnp.einsum("m,d->md", gd.flatten(), omega)
    pos_emb = jnp.concatenate(
        [jnp.sin(out_h), jnp.cos(out_h),
         jnp.sin(out_w), jnp.cos(out_w),
         jnp.sin(out_d), jnp.cos(out_d)], axis=1)[None, :, :]
    return pos_emb  # (1, L, embed_dim)


# --------------------------- fused Pallas kernel -----------------------------
def _moco_fused_kernel(m_ref, xp_ref, posm_ref, wcat_ref,
                       w1_ref, g1_ref, b1_ref, w2_ref,
                       loss_ref, wcat_out_ref):
    # m_ref     : SMEM (1,)                 momentum scalar
    # xp_ref    : VMEM (2B, L, P)           patchified tokens, rows 0..B-1 view1
    # posm_ref  : VMEM (1, D_PAD)           mean of pos-embed (cols>=96 zero)
    # wcat_ref  : VMEM (P, 2*D_PAD)         [base | momentum] patch-embed weights
    # w1_ref    : VMEM (D_PAD, MLP_DIM)     predictor linear1 (rows>=96 zero)
    # g1/b1     : VMEM (1, MLP_DIM)         BatchNorm1d affine params
    # w2_ref    : VMEM (MLP_DIM, D_PAD)     predictor linear2 (cols>=96 zero)
    # loss_ref  : SMEM (1,)                 scalar loss output
    # wcat_out  : VMEM (P, 2*D_PAD)         updated [base | momentum] weights
    m = m_ref[0]
    posm = posm_ref[...]                                   # (1, D_PAD) f32

    # token mean-pool inside the kernel (one sublane reduce over L=8)
    x4 = jnp.mean(xp_ref[...], axis=1)                     # (2B, P) f32
    wcat = wcat_ref[...]                                   # (P, 2*D_PAD) f32

    # --- encoder: one bf16 MXU matmul for both views and both branches ------
    e = jnp.dot(x4.astype(jnp.bfloat16), wcat.astype(jnp.bfloat16),
                preferred_element_type=jnp.float32)        # (2B, 2*D_PAD) f32
    e_base = e[:, :D_PAD]
    e_mom = e[:, D_PAD:]
    q4 = e_base + posm                                     # base-encoder features
    # new-momentum feature recovered algebraically (momentum update off path):
    # x @ (m*wm + (1-m)*wb) = m*(x@wm) + (1-m)*(x@wb)
    k4 = m * e_mom + (1.0 - m) * e_base + posm             # momentum features

    # --- momentum-weight update (overlaps with compute; aliased output) -----
    wb = wcat[:, :D_PAD]
    wm = wcat[:, D_PAD:]
    wcat_out_ref[:, :D_PAD] = wb
    wcat_out_ref[:, D_PAD:] = wm * m + wb * (1.0 - m)

    # --- predictor: Linear -> BN(per view) -> ReLU -> Linear -> BN(no affine)
    g1 = g1_ref[...]
    b1 = b1_ref[...]

    def bn_affine_relu(h):                                 # (B, MLP_DIM)
        s1 = jnp.mean(h, axis=0, keepdims=True)
        s2 = jnp.mean(h * h, axis=0, keepdims=True)
        var = jnp.maximum(s2 - s1 * s1, 0.0)
        hn = (h - s1) * lax.rsqrt(var + BN_EPS) * g1 + b1
        return jnp.maximum(hn, 0.0)

    def bn_noaffine(o):                                    # (B, D_PAD)
        s1 = jnp.mean(o, axis=0, keepdims=True)
        s2 = jnp.mean(o * o, axis=0, keepdims=True)
        var = jnp.maximum(s2 - s1 * s1, 0.0)
        return (o - s1) * lax.rsqrt(var + BN_EPS)

    h4 = jnp.dot(q4.astype(jnp.bfloat16), w1_ref[...].astype(jnp.bfloat16),
                 preferred_element_type=jnp.float32)       # (2B, MLP_DIM)
    h4 = jnp.concatenate([bn_affine_relu(h4[:B]), bn_affine_relu(h4[B:])], axis=0)

    o4 = jnp.dot(h4.astype(jnp.bfloat16), w2_ref[...].astype(jnp.bfloat16),
                 preferred_element_type=jnp.float32)       # (2B, D_PAD)
    q_all = jnp.concatenate([bn_noaffine(o4[:B]), bn_noaffine(o4[B:])], axis=0)

    # --- fused contrastive loss: ce(q1,k2) + ce(q2,k1) -----------------------
    k_perm = jnp.concatenate([k4[B:], k4[:B]], axis=0)     # [k2 ; k1]

    def normalize_rows(v):
        n2 = jnp.sum(v * v, axis=1, keepdims=True)
        return v * lax.rsqrt(jnp.maximum(n2, 1e-24))

    qn = normalize_rows(q_all)                             # (2B, D_PAD)
    kn = normalize_rows(k_perm)                            # (2B, D_PAD)

    inv_t = 1.0 / TEMP
    # diagonal (labels = arange) is just the per-row dot product
    diag = jnp.sum(qn * kn, axis=1, keepdims=True) * inv_t # (2B, 1)
    # single MXU push for both loss terms; only the two BxB blocks are used
    logits = lax.dot_general(
        qn.astype(jnp.bfloat16), kn.astype(jnp.bfloat16),
        dimension_numbers=(((1,), (1,)), ((), ())),
        preferred_element_type=jnp.float32) * inv_t        # (2B, 2B)

    def lse(z):
        mx = jnp.max(z, axis=1, keepdims=True)
        return mx + jnp.log(jnp.sum(jnp.exp(z - mx), axis=1, keepdims=True))

    ce1 = jnp.mean(lse(logits[:B, :B]) - diag[:B])
    ce2 = jnp.mean(lse(logits[B:, B:]) - diag[B:])
    loss_ref[0] = (ce1 + ce2) * (2.0 * TEMP)


def moco_fused(m_arr, xp, pos_mean, w_cat, w1, g1, b1, w2):
    vmem = pltpu.MemorySpace.VMEM
    smem = pltpu.MemorySpace.SMEM
    loss, w_cat_new = pl.pallas_call(
        _moco_fused_kernel,
        out_shape=(
            jax.ShapeDtypeStruct((1,), jnp.float32),
            jax.ShapeDtypeStruct(w_cat.shape, jnp.float32),
        ),
        in_specs=[
            pl.BlockSpec(memory_space=smem),   # m (scalar)
            pl.BlockSpec(memory_space=vmem),   # xp  (2B, L, P)
            pl.BlockSpec(memory_space=vmem),   # pos_mean
            pl.BlockSpec(memory_space=vmem),   # w_cat
            pl.BlockSpec(memory_space=vmem),   # w1
            pl.BlockSpec(memory_space=vmem),   # g1
            pl.BlockSpec(memory_space=vmem),   # b1
            pl.BlockSpec(memory_space=vmem),   # w2
        ],
        out_specs=(
            pl.BlockSpec(memory_space=smem),   # scalar loss
            pl.BlockSpec(memory_space=vmem),   # updated [base|momentum] weights
        ),
        input_output_aliases={3: 1},           # w_cat in -> w_cat_new out
    )(m_arr, xp, pos_mean, w_cat, w1, g1, b1, w2)
    return loss[0], w_cat_new


# ------------------------------ MoCo forward --------------------------------
def init_params(key):
    k_emb, k_w1, k_w2 = jax.random.split(key, 3)

    def pad_cols(w, total):
        return jnp.pad(w, ((0, 0), (0, total - w.shape[1])))

    w_base = 0.02 * jax.random.normal(k_emb, (OUT_CHANS, ENC_DIM), jnp.float32)
    w1 = 0.02 * jax.random.normal(k_w1, (ENC_DIM, MLP_DIM), jnp.float32)
    w2 = 0.02 * jax.random.normal(k_w2, (MLP_DIM, ENC_DIM), jnp.float32)
    pos = build_3d_sincos_position_embedding(GRID_SIZE, ENC_DIM)      # (1, L, D)
    pos_mean = jnp.mean(pos, axis=1)                                  # (1, D)

    w_base_p = pad_cols(w_base, D_PAD)                 # (P, 128), cols>=96 zero
    # base and momentum weights stored pre-concatenated (momentum copy == base,
    # as in the reference __init__); avoids any concat on the critical path.
    w_cat = jnp.concatenate([w_base_p, w_base_p], axis=1)             # (P, 256)
    params = {
        "w_cat": w_cat,
        "w1": jnp.pad(w1, ((0, D_PAD - ENC_DIM), (0, 0))),   # (128,128), rows>=96 zero
        "g1": jnp.ones((1, MLP_DIM), jnp.float32),
        "b1": jnp.zeros((1, MLP_DIM), jnp.float32),
        "w2": pad_cols(w2, D_PAD),                            # (128,128), cols>=96 zero
        "pos_mean": pad_cols(pos_mean, D_PAD),                # (1,128), cols>=96 zero
    }
    return params


@jax.jit
def moco_forward(params, x1, x2, m):
    x1p = patchify_image(x1, PATCH_SIZE)               # (B, L, P)
    x2p = patchify_image(x2, PATCH_SIZE)
    xp = jnp.concatenate([x1p, x2p], axis=0)           # (2B, L, P); mean taken in-kernel
    m_arr = jnp.asarray(m, jnp.float32).reshape(1)
    loss, w_cat_new = moco_fused(
        m_arr, xp, params["pos_mean"], params["w_cat"],
        params["w1"], params["g1"], params["b1"], params["w2"])
    return loss, w_cat_new


# --------------------------------- main --------------------------------------
if __name__ == "__main__":
    key = jax.random.PRNGKey(0)
    k_params, k_x1, k_x2 = jax.random.split(key, 3)

    params = init_params(k_params)
    x1 = jax.random.normal(k_x1, (B, IN_CHANS) + INPUT_SIZE, jnp.float32)
    x2 = jax.random.normal(k_x2, (B, IN_CHANS) + INPUT_SIZE, jnp.float32)
    m = 0.99

    loss, new_w_cat = moco_forward(params, x1, x2, m)
    loss = jax.block_until_ready(loss)
    new_w_cat = jax.block_until_ready(new_w_cat)

    assert loss.shape == () and bool(jnp.isfinite(loss))
    assert new_w_cat.shape == (OUT_CHANS, 2 * D_PAD)
    assert bool(jnp.all(jnp.isfinite(new_w_cat)))
    print("KERNEL_OK")
</pallas_src>

<mosaic_0001>
module attributes {stable_mosaic.version = 11 : i64} {
  func.func @_moco_fused_kernel(%arg0: memref<1xf32, #tpu.memory_space<smem>>, %arg1: memref<4x8x128xf32, #tpu.memory_space<vmem>>, %arg2: memref<1x128xf32, #tpu.memory_space<vmem>>, %arg3: memref<128x256xf32, #tpu.memory_space<vmem>>, %arg4: memref<128x128xf32, #tpu.memory_space<vmem>>, %arg5: memref<1x128xf32, #tpu.memory_space<vmem>>, %arg6: memref<1x128xf32, #tpu.memory_space<vmem>>, %arg7: memref<128x128xf32, #tpu.memory_space<vmem>>, %arg8: memref<1xf32, #tpu.memory_space<smem>>, %arg9: memref<128x256xf32, #tpu.memory_space<vmem>>) attributes {dimension_semantics = [], scalar_prefetch = 0 : i64, scratch_operands = 0 : i64, tpu.core_type = #tpu.core_type<tc>} {
    %c0 = arith.constant 0 : index
    %0 = memref.load %arg0[%c0] : memref<1xf32, #tpu.memory_space<smem>>
    %c0_0 = arith.constant 0 : index
    %c0_1 = arith.constant 0 : index
    %1 = vector.load %arg2[%c0_0, %c0_1] : memref<1x128xf32, #tpu.memory_space<vmem>>, vector<1x128xf32>
    %c0_2 = arith.constant 0 : index
    %c0_3 = arith.constant 0 : index
    %c0_4 = arith.constant 0 : index
    %2 = vector.load %arg1[%c0_2, %c0_3, %c0_4] : memref<4x8x128xf32, #tpu.memory_space<vmem>>, vector<4x8x128xf32>
    %cst = arith.constant dense<0.000000e+00> : vector<4x128xf32>
    %3 = vector.multi_reduction <add>, %2, %cst [1] : vector<4x8x128xf32> to vector<4x128xf32>
    %cst_5 = arith.constant 8.000000e+00 : f32
    %4 = vector.broadcast %cst_5 : f32 to vector<4x128xf32>
    %5 = arith.divf %3, %4 : vector<4x128xf32>
    %c0_6 = arith.constant 0 : index
    %c0_7 = arith.constant 0 : index
    %6 = vector.load %arg3[%c0_6, %c0_7] : memref<128x256xf32, #tpu.memory_space<vmem>>, vector<128x256xf32>
    %7 = arith.truncf %5 : vector<4x128xf32> to vector<4x128xbf16>
    %8 = arith.truncf %6 : vector<128x256xf32> to vector<128x256xbf16>
    %cst_8 = arith.constant dense<0.000000e+00> : vector<4x256xf32>
    %9 = tpu.matmul %7, %8, %cst_8 {dimension_numbers = #tpu.dot_dimension_numbers<[1], [0], [0], [1], [0, 0, 1, 1], [], []>} : vector<4x128xbf16>, vector<128x256xbf16>, vector<4x256xf32> -> vector<4x256xf32>
    %10 = vector.extract_strided_slice %9 {offsets = [0, 0], sizes = [4, 128], strides = [1, 1]} : vector<4x256xf32> to vector<4x128xf32>
    %11 = vector.extract_strided_slice %9 {offsets = [0, 128], sizes = [4, 128], strides = [1, 1]} : vector<4x256xf32> to vector<4x128xf32>
    %12 = vector.broadcast %1 : vector<1x128xf32> to vector<4x128xf32>
    %13 = arith.addf %10, %12 : vector<4x128xf32>
    %14 = vector.broadcast %0 : f32 to vector<4x128xf32>
    %15 = arith.mulf %14, %11 : vector<4x128xf32>
    %cst_9 = arith.constant 1.000000e+00 : f32
    %16 = arith.subf %cst_9, %0 : f32
    %17 = vector.broadcast %16 : f32 to vector<4x128xf32>
    %18 = arith.mulf %17, %10 : vector<4x128xf32>
    %19 = arith.addf %15, %18 : vector<4x128xf32>
    %20 = vector.broadcast %1 : vector<1x128xf32> to vector<4x128xf32>
    %21 = arith.addf %19, %20 : vector<4x128xf32>
    %22 = vector.extract_strided_slice %6 {offsets = [0, 0], sizes = [128, 128], strides = [1, 1]} : vector<128x256xf32> to vector<128x128xf32>
    %23 = vector.extract_strided_slice %6 {offsets = [0, 128], sizes = [128, 128], strides = [1, 1]} : vector<128x256xf32> to vector<128x128xf32>
    %c0_10 = arith.constant 0 : index
    %c0_11 = arith.constant 0 : index
    %24 = vector.load %arg9[%c0_10, %c0_11] : memref<128x256xf32, #tpu.memory_space<vmem>>, vector<128x128xf32>
    tpu.vector_store %arg9[%c0_10, %c0_11], %22 {strides = array<i32>} : memref<128x256xf32, #tpu.memory_space<vmem>>, vector<128x128xf32>,
    %25 = vector.broadcast %0 : f32 to vector<128x128xf32>
    %26 = arith.mulf %23, %25 : vector<128x128xf32>
    %cst_12 = arith.constant 1.000000e+00 : f32
    %27 = arith.subf %cst_12, %0 : f32
    %28 = vector.broadcast %27 : f32 to vector<128x128xf32>
    %29 = arith.mulf %22, %28 : vector<128x128xf32>
    %30 = arith.addf %26, %29 : vector<128x128xf32>
    %c0_13 = arith.constant 0 : index
    %c128 = arith.constant 128 : index
    %31 = vector.load %arg9[%c0_13, %c128] : memref<128x256xf32, #tpu.memory_space<vmem>>, vector<128x128xf32>
    tpu.vector_store %arg9[%c0_13, %c128], %30 {strides = array<i32>} : memref<128x256xf32, #tpu.memory_space<vmem>>, vector<128x128xf32>,
    %c0_14 = arith.constant 0 : index
    %c0_15 = arith.constant 0 : index
    %32 = vector.load %arg5[%c0_14, %c0_15] : memref<1x128xf32, #tpu.memory_space<vmem>>, vector<1x128xf32>
    %c0_16 = arith.constant 0 : index
    %c0_17 = arith.constant 0 : index
    %33 = vector.load %arg6[%c0_16, %c0_17] : memref<1x128xf32, #tpu.memory_space<vmem>>, vector<1x128xf32>
    %34 = arith.truncf %13 : vector<4x128xf32> to vector<4x128xbf16>
    %c0_18 = arith.constant 0 : index
    %c0_19 = arith.constant 0 : index
    %35 = vector.load %arg4[%c0_18, %c0_19] : memref<128x128xf32, #tpu.memory_space<vmem>>, vector<128x128xf32>
    %36 = arith.truncf %35 : vector<128x128xf32> to vector<128x128xbf16>
    %cst_20 = arith.constant dense<0.000000e+00> : vector<4x128xf32>
    %37 = tpu.matmul %34, %36, %cst_20 {dimension_numbers = #tpu.dot_dimension_numbers<[1], [0], [0], [1], [0, 0, 1, 1], [], []>} : vector<4x128xbf16>, vector<128x128xbf16>, vector<4x128xf32> -> vector<4x128xf32>
    %38 = vector.extract_strided_slice %37 {offsets = [0, 0], sizes = [2, 128], strides = [1, 1]} : vector<4x128xf32> to vector<2x128xf32>
    %cst_21 = arith.constant dense<0.000000e+00> : vector<128xf32>
    %39 = vector.multi_reduction <add>, %38, %cst_21 [0] : vector<2x128xf32> to vector<128xf32>
    %40 = vector.shape_cast %39 : vector<128xf32> to vector<1x128xf32>
    %cst_22 = arith.constant 2.000000e+00 : f32
    %41 = vector.broadcast %cst_22 : f32 to vector<1x128xf32>
    %42 = arith.divf %40, %41 : vector<1x128xf32>
    %43 = arith.mulf %38, %38 : vector<2x128xf32>
    %cst_23 = arith.constant dense<0.000000e+00> : vector<128xf32>
    %44 = vector.multi_reduction <add>, %43, %cst_23 [0] : vector<2x128xf32> to vector<128xf32>
    %45 = vector.shape_cast %44 : vector<128xf32> to vector<1x128xf32>
    %cst_24 = arith.constant 2.000000e+00 : f32
    %46 = vector.broadcast %cst_24 : f32 to vector<1x128xf32>
    %47 = arith.divf %45, %46 : vector<1x128xf32>
    %48 = arith.mulf %42, %42 : vector<1x128xf32>
    %49 = arith.subf %47, %48 : vector<1x128xf32>
    %cst_25 = arith.constant 0.000000e+00 : f32
    %50 = vector.broadcast %cst_25 : f32 to vector<1x128xf32>
    %51 = arith.maximumf %49, %50 : vector<1x128xf32>
    %52 = vector.broadcast %42 : vector<1x128xf32> to vector<2x128xf32>
    %53 = arith.subf %38, %52 : vector<2x128xf32>
    %cst_26 = arith.constant 9.99999974E-6 : f32
    %54 = vector.broadcast %cst_26 : f32 to vector<1x128xf32>
    %55 = arith.addf %51, %54 : vector<1x128xf32>
    %56 = math.rsqrt %55 : vector<1x128xf32>
    %57 = vector.broadcast %56 : vector<1x128xf32> to vector<2x128xf32>
    %58 = arith.mulf %53, %57 : vector<2x128xf32>
    %59 = vector.broadcast %32 : vector<1x128xf32> to vector<2x128xf32>
    %60 = arith.mulf %58, %59 : vector<2x128xf32>
    %61 = vector.broadcast %33 : vector<1x128xf32> to vector<2x128xf32>
    %62 = arith.addf %60, %61 : vector<2x128xf32>
    %cst_27 = arith.constant 0.000000e+00 : f32
    %63 = vector.broadcast %cst_27 : f32 to vector<2x128xf32>
    %64 = arith.maximumf %62, %63 : vector<2x128xf32>
    %65 = vector.extract_strided_slice %37 {offsets = [2, 0], sizes = [2, 128], strides = [1, 1]} : vector<4x128xf32> to vector<2x128xf32>
    %cst_28 = arith.constant dense<0.000000e+00> : vector<128xf32>
    %66 = vector.multi_reduction <add>, %65, %cst_28 [0] : vector<2x128xf32> to vector<128xf32>
    %67 = vector.shape_cast %66 : vector<128xf32> to vector<1x128xf32>
    %cst_29 = arith.constant 2.000000e+00 : f32
    %68 = vector.broadcast %cst_29 : f32 to vector<1x128xf32>
    %69 = arith.divf %67, %68 : vector<1x128xf32>
    %70 = arith.mulf %65, %65 : vector<2x128xf32>
    %cst_30 = arith.constant dense<0.000000e+00> : vector<128xf32>
    %71 = vector.multi_reduction <add>, %70, %cst_30 [0] : vector<2x128xf32> to vector<128xf32>
    %72 = vector.shape_cast %71 : vector<128xf32> to vector<1x128xf32>
    %cst_31 = arith.constant 2.000000e+00 : f32
    %73 = vector.broadcast %cst_31 : f32 to vector<1x128xf32>
    %74 = arith.divf %72, %73 : vector<1x128xf32>
    %75 = arith.mulf %69, %69 : vector<1x128xf32>
    %76 = arith.subf %74, %75 : vector<1x128xf32>
    %cst_32 = arith.constant 0.000000e+00 : f32
    %77 = vector.broadcast %cst_32 : f32 to vector<1x128xf32>
    %78 = arith.maximumf %76, %77 : vector<1x128xf32>
    %79 = vector.broadcast %69 : vector<1x128xf32> to vector<2x128xf32>
    %80 = arith.subf %65, %79 : vector<2x128xf32>
    %cst_33 = arith.constant 9.99999974E-6 : f32
    %81 = vector.broadcast %cst_33 : f32 to vector<1x128xf32>
    %82 = arith.addf %78, %81 : vector<1x128xf32>
    %83 = math.rsqrt %82 : vector<1x128xf32>
    %84 = vector.broadcast %83 : vector<1x128xf32> to vector<2x128xf32>
    %85 = arith.mulf %80, %84 : vector<2x128xf32>
    %86 = vector.broadcast %32 : vector<1x128xf32> to vector<2x128xf32>
    %87 = arith.mulf %85, %86 : vector<2x128xf32>
    %88 = vector.broadcast %33 : vector<1x128xf32> to vector<2x128xf32>
    %89 = arith.addf %87, %88 : vector<2x128xf32>
    %cst_34 = arith.constant 0.000000e+00 : f32
    %90 = vector.broadcast %cst_34 : f32 to vector<2x128xf32>
    %91 = arith.maximumf %89, %90 : vector<2x128xf32>
    %92 = tpu.concatenate %64, %91 in 0 : vector<2x128xf32>, vector<2x128xf32> -> vector<4x128xf32>
    %93 = arith.truncf %92 : vector<4x128xf32> to vector<4x128xbf16>
    %c0_35 = arith.constant 0 : index
    %c0_36 = arith.constant 0 : index
    %94 = vector.load %arg7[%c0_35, %c0_36] : memref<128x128xf32, #tpu.memory_space<vmem>>, vector<128x128xf32>
    %95 = arith.truncf %94 : vector<128x128xf32> to vector<128x128xbf16>
    %cst_37 = arith.constant dense<0.000000e+00> : vector<4x128xf32>
    %96 = tpu.matmul %93, %95, %cst_37 {dimension_numbers = #tpu.dot_dimension_numbers<[1], [0], [0], [1], [0, 0, 1, 1], [], []>} : vector<4x128xbf16>, vector<128x128xbf16>, vector<4x128xf32> -> vector<4x128xf32>
    %97 = vector.extract_strided_slice %96 {offsets = [0, 0], sizes = [2, 128], strides = [1, 1]} : vector<4x128xf32> to vector<2x128xf32>
    %cst_38 = arith.constant dense<0.000000e+00> : vector<128xf32>
    %98 = vector.multi_reduction <add>, %97, %cst_38 [0] : vector<2x128xf32> to vector<128xf32>
    %99 = vector.shape_cast %98 : vector<128xf32> to vector<1x128xf32>
    %cst_39 = arith.constant 2.000000e+00 : f32
    %100 = vector.broadcast %cst_39 : f32 to vector<1x128xf32>
    %101 = arith.divf %99, %100 : vector<1x128xf32>
    %102 = arith.mulf %97, %97 : vector<2x128xf32>
    %cst_40 = arith.constant dense<0.000000e+00> : vector<128xf32>
    %103 = vector.multi_reduction <add>, %102, %cst_40 [0] : vector<2x128xf32> to vector<128xf32>
    %104 = vector.shape_cast %103 : vector<128xf32> to vector<1x128xf32>
    %cst_41 = arith.constant 2.000000e+00 : f32
    %105 = vector.broadcast %cst_41 : f32 to vector<1x128xf32>
    %106 = arith.divf %104, %105 : vector<1x128xf32>
    %107 = arith.mulf %101, %101 : vector<1x128xf32>
    %108 = arith.subf %106, %107 : vector<1x128xf32>
    %cst_42 = arith.constant 0.000000e+00 : f32
    %109 = vector.broadcast %cst_42 : f32 to vector<1x128xf32>
    %110 = arith.maximumf %108, %109 : vector<1x128xf32>
    %111 = vector.broadcast %101 : vector<1x128xf32> to vector<2x128xf32>
    %112 = arith.subf %97, %111 : vector<2x128xf32>
    %cst_43 = arith.constant 9.99999974E-6 : f32
    %113 = vector.broadcast %cst_43 : f32 to vector<1x128xf32>
    %114 = arith.addf %110, %113 : vector<1x128xf32>
    %115 = math.rsqrt %114 : vector<1x128xf32>
    %116 = vector.broadcast %115 : vector<1x128xf32> to vector<2x128xf32>
    %117 = arith.mulf %112, %116 : vector<2x128xf32>
    %118 = vector.extract_strided_slice %96 {offsets = [2, 0], sizes = [2, 128], strides = [1, 1]} : vector<4x128xf32> to vector<2x128xf32>
    %cst_44 = arith.constant dense<0.000000e+00> : vector<128xf32>
    %119 = vector.multi_reduction <add>, %118, %cst_44 [0] : vector<2x128xf32> to vector<128xf32>
    %120 = vector.shape_cast %119 : vector<128xf32> to vector<1x128xf32>
    %cst_45 = arith.constant 2.000000e+00 : f32
    %121 = vector.broadcast %cst_45 : f32 to vector<1x128xf32>
    %122 = arith.divf %120, %121 : vector<1x128xf32>
    %123 = arith.mulf %118, %118 : vector<2x128xf32>
    %cst_46 = arith.constant dense<0.000000e+00> : vector<128xf32>
    %124 = vector.multi_reduction <add>, %123, %cst_46 [0] : vector<2x128xf32> to vector<128xf32>
    %125 = vector.shape_cast %124 : vector<128xf32> to vector<1x128xf32>
    %cst_47 = arith.constant 2.000000e+00 : f32
    %126 = vector.broadcast %cst_47 : f32 to vector<1x128xf32>
    %127 = arith.divf %125, %126 : vector<1x128xf32>
    %128 = arith.mulf %122, %122 : vector<1x128xf32>
    %129 = arith.subf %127, %128 : vector<1x128xf32>
    %cst_48 = arith.constant 0.000000e+00 : f32
    %130 = vector.broadcast %cst_48 : f32 to vector<1x128xf32>
    %131 = arith.maximumf %129, %130 : vector<1x128xf32>
    %132 = vector.broadcast %122 : vector<1x128xf32> to vector<2x128xf32>
    %133 = arith.subf %118, %132 : vector<2x128xf32>
    %cst_49 = arith.constant 9.99999974E-6 : f32
    %134 = vector.broadcast %cst_49 : f32 to vector<1x128xf32>
    %135 = arith.addf %131, %134 : vector<1x128xf32>
    %136 = math.rsqrt %135 : vector<1x128xf32>
    %137 = vector.broadcast %136 : vector<1x128xf32> to vector<2x128xf32>
    %138 = arith.mulf %133, %137 : vector<2x128xf32>
    %139 = tpu.concatenate %117, %138 in 0 : vector<2x128xf32>, vector<2x128xf32> -> vector<4x128xf32>
    %140 = vector.extract_strided_slice %21 {offsets = [2, 0], sizes = [2, 128], strides = [1, 1]} : vector<4x128xf32> to vector<2x128xf32>
    %141 = vector.extract_strided_slice %21 {offsets = [0, 0], sizes = [2, 128], strides = [1, 1]} : vector<4x128xf32> to vector<2x128xf32>
    %142 = tpu.concatenate %140, %141 in 0 : vector<2x128xf32>, vector<2x128xf32> -> vector<4x128xf32>
    %143 = arith.mulf %139, %139 : vector<4x128xf32>
    %cst_50 = arith.constant dense<0.000000e+00> : vector<4xf32>
    %144 = vector.multi_reduction <add>, %143, %cst_50 [1] : vector<4x128xf32> to vector<4xf32>
    %145 = vector.shape_cast %144 : vector<4xf32> to vector<4x1xf32>
    %cst_51 = arith.constant 1.000000e-24 : f32
    %146 = vector.broadcast %cst_51 : f32 to vector<4x1xf32>
    %147 = arith.maximumf %145, %146 : vector<4x1xf32>
    %148 = math.rsqrt %147 : vector<4x1xf32>
    %149 = vector.broadcast %148 : vector<4x1xf32> to vector<4x128xf32>
    %150 = arith.mulf %139, %149 : vector<4x128xf32>
    %151 = arith.mulf %142, %142 : vector<4x128xf32>
    %cst_52 = arith.constant dense<0.000000e+00> : vector<4xf32>
    %152 = vector.multi_reduction <add>, %151, %cst_52 [1] : vector<4x128xf32> to vector<4xf32>
    %153 = vector.shape_cast %152 : vector<4xf32> to vector<4x1xf32>
    %cst_53 = arith.constant 1.000000e-24 : f32
    %154 = vector.broadcast %cst_53 : f32 to vector<4x1xf32>
    %155 = arith.maximumf %153, %154 : vector<4x1xf32>
    %156 = math.rsqrt %155 : vector<4x1xf32>
    %157 = vector.broadcast %156 : vector<4x1xf32> to vector<4x128xf32>
    %158 = arith.mulf %142, %157 : vector<4x128xf32>
    %159 = arith.mulf %150, %158 : vector<4x128xf32>
    %cst_54 = arith.constant dense<0.000000e+00> : vector<4xf32>
    %160 = vector.multi_reduction <add>, %159, %cst_54 [1] : vector<4x128xf32> to vector<4xf32>
    %161 = vector.shape_cast %160 : vector<4xf32> to vector<4x1xf32>
    %cst_55 = arith.constant 5.000000e+00 : f32
    %162 = vector.broadcast %cst_55 : f32 to vector<4x1xf32>
    %163 = arith.mulf %161, %162 : vector<4x1xf32>
    %164 = arith.truncf %150 : vector<4x128xf32> to vector<4x128xbf16>
    %165 = arith.truncf %158 : vector<4x128xf32> to vector<4x128xbf16>
    %cst_56 = arith.constant dense<0.000000e+00> : vector<4x4xf32>
    %166 = tpu.matmul %164, %165, %cst_56 {dimension_numbers = #tpu.dot_dimension_numbers<[1], [1], [0], [0], [0, 0, 1, 0], [], []>} : vector<4x128xbf16>, vector<4x128xbf16>, vector<4x4xf32> -> vector<4x4xf32>
    %cst_57 = arith.constant 5.000000e+00 : f32
    %167 = vector.broadcast %cst_57 : f32 to vector<4x4xf32>
    %168 = arith.mulf %166, %167 : vector<4x4xf32>
    %169 = vector.extract_strided_slice %168 {offsets = [0, 0], sizes = [2, 2], strides = [1, 1]} : vector<4x4xf32> to vector<2x2xf32>
    %cst_58 = arith.constant dense<0xFF800000> : vector<2xf32>
    %170 = vector.multi_reduction <maximumf>, %169, %cst_58 [1] : vector<2x2xf32> to vector<2xf32>
    %171 = vector.shape_cast %170 : vector<2xf32> to vector<2x1xf32>
    %172 = vector.broadcast %171 : vector<2x1xf32> to vector<2x2xf32>
    %173 = arith.subf %169, %172 : vector<2x2xf32>
    %174 = math.exp %173 : vector<2x2xf32>
    %cst_59 = arith.constant dense<0.000000e+00> : vector<2xf32>
    %175 = vector.multi_reduction <add>, %174, %cst_59 [1] : vector<2x2xf32> to vector<2xf32>
    %176 = vector.shape_cast %175 : vector<2xf32> to vector<2x1xf32>
    %177 = math.log %176 : vector<2x1xf32>
    %178 = arith.addf %171, %177 : vector<2x1xf32>
    %179 = vector.extract_strided_slice %163 {offsets = [0, 0], sizes = [2, 1], strides = [1, 1]} : vector<4x1xf32> to vector<2x1xf32>
    %180 = arith.subf %178, %179 : vector<2x1xf32>
    %181 = vector.shape_cast %180 : vector<2x1xf32> to vector<1x2x1xf32>
    %cst_60 = arith.constant dense<0.000000e+00> : vector<1xf32>
    %182 = vector.multi_reduction <add>, %181, %cst_60 [1, 2] : vector<1x2x1xf32> to vector<1xf32>
    %183 = vector.shape_cast %182 : vector<1xf32> to vector<1x1x1xf32>
    %184 = vector.extract %183[0, 0, 0] : f32 from vector<1x1x1xf32>
    %cst_61 = arith.constant 2.000000e+00 : f32
    %185 = arith.divf %184, %cst_61 : f32
    %186 = vector.extract_strided_slice %168 {offsets = [2, 2], sizes = [2, 2], strides = [1, 1]} : vector<4x4xf32> to vector<2x2xf32>
    %cst_62 = arith.constant dense<0xFF800000> : vector<2xf32>
    %187 = vector.multi_reduction <maximumf>, %186, %cst_62 [1] : vector<2x2xf32> to vector<2xf32>
    %188 = vector.shape_cast %187 : vector<2xf32> to vector<2x1xf32>
    %189 = vector.broadcast %188 : vector<2x1xf32> to vector<2x2xf32>
    %190 = arith.subf %186, %189 : vector<2x2xf32>
    %191 = math.exp %190 : vector<2x2xf32>
    %cst_63 = arith.constant dense<0.000000e+00> : vector<2xf32>
    %192 = vector.multi_reduction <add>, %191, %cst_63 [1] : vector<2x2xf32> to vector<2xf32>
    %193 = vector.shape_cast %192 : vector<2xf32> to vector<2x1xf32>
    %194 = math.log %193 : vector<2x1xf32>
    %195 = arith.addf %188, %194 : vector<2x1xf32>
    %196 = vector.extract_strided_slice %163 {offsets = [2, 0], sizes = [2, 1], strides = [1, 1]} : vector<4x1xf32> to vector<2x1xf32>
    %197 = arith.subf %195, %196 : vector<2x1xf32>
    %198 = vector.shape_cast %197 : vector<2x1xf32> to vector<1x2x1xf32>
    %cst_64 = arith.constant dense<0.000000e+00> : vector<1xf32>
    %199 = vector.multi_reduction <add>, %198, %cst_64 [1, 2] : vector<1x2x1xf32> to vector<1xf32>
    %200 = vector.shape_cast %199 : vector<1xf32> to vector<1x1x1xf32>
    %201 = vector.extract %200[0, 0, 0] : f32 from vector<1x1x1xf32>
    %cst_65 = arith.constant 2.000000e+00 : f32
    %202 = arith.divf %201, %cst_65 : f32
    %203 = arith.addf %185, %202 : f32
    %cst_66 = arith.constant 4.000000e-01 : f32
    %204 = arith.mulf %203, %cst_66 : f32
    %c0_67 = arith.constant 0 : index
    %205 = memref.load %arg8[%c0_67] : memref<1xf32, #tpu.memory_space<smem>>
    memref.store %204, %arg8[%c0_67] : memref<1xf32, #tpu.memory_space<smem>>
    return
  }
}

</mosaic_0001>

<bundles_post_ra>
// kernel: moco_forward.1
= control target key start
LH: loop header
LB: loop body
LE: loop exit
PB: predicated region body
PF: predicated region fallthrough
CT: control target
= control target key end

     0   :  { %v711_v9 = vmov 8.0   ;;  %s1262_s0 = inlined_call_operand.<no memory space> [shape: f32[1], index: 0, kind: input, shape index: {}]   ;;  %s1263_s1 = inlined_call_operand.vmem [shape: f32[4,8,128], index: 1, kind: input, shape index: {}]   ;;  %s1264_s2 = inlined_call_operand.vmem [shape: f32[1,128], index: 2, kind: input, shape index: {}]   ;;  %s1265_s3 = inlined_call_operand.vmem [shape: f32[128,256], index: 3, kind: input, shape index: {}, may-alias: {3,9}]   ;;  %s1266_s4 = inlined_call_operand.vmem [shape: f32[128,128], index: 4, kind: input, shape index: {}]   ;;  %s1267_s5 = inlined_call_operand.vmem [shape: f32[1,128], index: 5, kind: input, shape index: {}]   ;;  %s1268_s6 = inlined_call_operand.vmem [shape: f32[1,128], index: 6, kind: input, shape index: {}]   ;;  %s1269_s7 = inlined_call_operand.vmem [shape: f32[128,128], index: 7, kind: input, shape index: {}]   ;;  %s1270_s8 = inlined_call_operand.hbm [shape: f32[1], index: 8, kind: output, shape index: {0}]   ;;  %s1271_s9 = inlined_call_operand.vmem [shape: f32[128,256], index: 9, kind: output, shape index: {1}, may-alias: {3,9}]  }
   0x1   :  { %v103_v0 = vld [vmem:[%s1265_s3 + $0xe0] sm:$0xff]  ;;  %v105_v1 = vld [vmem:[%s1265_s3 + $0xf0] sm:$0xff]  ;;  %s175_s15 = ssub.f32 1.0, %s1262_s0  ;;  %v104_v2 = vld [vmem:[%s1265_s3 + $0xe8] sm:$0xff]  ;;  %v780_v3 = vstv %s1262_s0  ;;  %673 = vrcp.f32 %v711_v9 }
   0x2   :  { %v125_v4 = vpack.c.bf16 %v105_v1, %v103_v0  ;;  %194 = vst [vmem:[%s1271_s9 + $0xe0] sm:$0xff] %v103_v0  ;;  %v210_v6 = vmul.f32 %v780_v3, %v104_v2 }
   0x3   :  { %v795_v10 = vstv %s175_s15 }
   0x4   :  { %143 = vmatpush.bf16.msra.mxu0 %v125_v4  ;;  %v226_v16 = vmul.f32 %v795_v10, %v103_v0  ;;  %v227_v17 = vmul.f32 %v795_v10, %v105_v1  ;;  %v36_v0 = vld [vmem:[%s1263_s1] sm:$0xff] }
   0x6   :  { %v242_v24 = vadd.f32 %v226_v16, %v210_v6 }
   0x7   :  { %v842_v34 = vpop.eup %673 }
   0x8   :  { %v873_v48 = vmul.f32 8.0, %v842_v34 }
   0x9   :  { %v106_v5 = vld [vmem:[%s1265_s3 + $0xf8] sm:$0xff]  ;;  %v99_v7 = vld [vmem:[%s1265_s3 + $0xc0] sm:$0xff]  ;;  %v101_v8 = vld [vmem:[%s1265_s3 + $0xd0] sm:$0xff] }
   0xa   :  { %195 = vst [vmem:[%s1271_s9 + $0xf0] sm:$0xff] %v105_v1  ;;  %v126_v11 = vpack.c.bf16 %v106_v5, %v104_v2  ;;  %v211_v12 = vmul.f32 %v780_v3, %v106_v5  ;;  %v123_v13 = vpack.c.bf16 %v101_v8, %v99_v7  ;;  %v224_v18 = vmul.f32 %v795_v10, %v99_v7  ;;  %v37_v1 = vld [vmem:[%s1263_s1 + $0x8] sm:$0xff] }
   0xb   :  { %v225_v21 = vmul.f32 %v795_v10, %v101_v8 }
   0xc   :  { %156 = vmatpush.bf16.msra.mxu1 %v126_v11  ;;  %v243_v25 = vadd.f32 %v227_v17, %v211_v12  ;;  %144 = vmatpush.bf16.msra.mxu0 %v123_v13 }
  0x11   :  { %v100_v14 = vld [vmem:[%s1265_s3 + $0xc8] sm:$0xff]  ;;  %v102_v15 = vld [vmem:[%s1265_s3 + $0xd8] sm:$0xff] }
  0x12   :  { %192 = vst [vmem:[%s1271_s9 + $0xc0] sm:$0xff] %v99_v7  ;;  %v124_v22 = vpack.c.bf16 %v102_v15, %v100_v14  ;;  %v208_v23 = vmul.f32 %v780_v3, %v100_v14  ;;  %v209_v26 = vmul.f32 %v780_v3, %v102_v15  ;;  %v38_v7 = vld [vmem:[%s1263_s1 + $0x10] sm:$0xff] }
  0x14   :  { %v240_v29 = vadd.f32 %v224_v18, %v208_v23  ;;  %v241_v35 = vadd.f32 %v225_v21, %v209_v26  ;;  %157 = vmatpush.bf16.msra.mxu1 %v124_v22 }
  0x19   :  { %v95_v19 = vld [vmem:[%s1265_s3 + $0xa0] sm:$0xff]  ;;  %v97_v20 = vld [vmem:[%s1265_s3 + $0xb0] sm:$0xff] }
  0x1a   :  { %193 = vst [vmem:[%s1271_s9 + $0xd0] sm:$0xff] %v101_v8  ;;  %v121_v30 = vpack.c.bf16 %v97_v20, %v95_v19  ;;  %v222_v31 = vmul.f32 %v795_v10, %v95_v19  ;;  %v223_v32 = vmul.f32 %v795_v10, %v97_v20  ;;  %v66_v8 = vsub.f32 1.0, %v873_v48 }
  0x1b   :  { %190 = vst [vmem:[%s1271_s9 + $0xa0] sm:$0xff] %v95_v19  ;;  %v40_v19 = vrot.slane %v36_v0, 4 }
  0x1c   :  { %145 = vmatpush.bf16.msra.mxu0 %v121_v30 }
  0x22   :  { %v96_v27 = vld [vmem:[%s1265_s3 + $0xa8] sm:$0xff]  ;;  %v98_v28 = vld [vmem:[%s1265_s3 + $0xb8] sm:$0xff] }
  0x23   :  { %191 = vst [vmem:[%s1271_s9 + $0xb0] sm:$0xff] %v97_v20  ;;  %v206_v36 = vmul.f32 %v780_v3, %v96_v27  ;;  %v207_v37 = vmul.f32 %v780_v3, %v98_v28  ;;  %v122_v41 = vpack.c.bf16 %v98_v28, %v96_v27  ;;  %v46_v20 = vrot.slane %v37_v1, 4 }
  0x25   :  { %v238_v44 = vadd.f32 %v222_v31, %v206_v36  ;;  %v239_v45 = vadd.f32 %v223_v32, %v207_v37  ;;  %158 = vmatpush.bf16.msra.mxu1 %v122_v41 }
  0x2a   :  { %v91_v33 = vld [vmem:[%s1265_s3 + $0x80] sm:$0xff] }
  0x2b   :  { %258 = vst [vmem:[%s1271_s9 + $0xe8] sm:$0xff] %v242_v24  ;;  %v220_v42 = vmul.f32 %v795_v10, %v91_v33  ;;  %v39_v24 = vld [vmem:[%s1263_s1 + $0x18] sm:$0xff] }
  0x32   :  { %v93_v38 = vld [vmem:[%s1265_s3 + $0x90] sm:$0xff]  ;;  %v92_v39 = vld [vmem:[%s1265_s3 + $0x88] sm:$0xff]  ;;  %v94_v40 = vld [vmem:[%s1265_s3 + $0x98] sm:$0xff] }
  0x33   :  { %259 = vst [vmem:[%s1271_s9 + $0xf8] sm:$0xff] %v243_v25  ;;  %v221_v43 = vmul.f32 %v795_v10, %v93_v38  ;;  %v204_v46 = vmul.f32 %v780_v3, %v92_v39  ;;  %v119_v49 = vpack.c.bf16 %v93_v38, %v91_v33  ;;  %v120_v50 = vpack.c.bf16 %v94_v40, %v92_v39 }
  0x34   :  { %256 = vst [vmem:[%s1271_s9 + $0xc8] sm:$0xff] %v240_v29  ;;  %v205_v51 = vmul.f32 %v780_v3, %v94_v40  ;;  %v52_v25 = vrot.slane %v38_v7, 4 }
  0x35   :  { %v236_v55 = vadd.f32 %v220_v42, %v204_v46  ;;  %146 = vmatpush.bf16.msra.mxu0 %v119_v49  ;;  %159 = vmatpush.bf16.msra.mxu1 %v120_v50 }
  0x36   :  { %v237_v60 = vadd.f32 %v221_v43, %v205_v51 }
  0x3b   :  { %v870_v47 = vld [vmem:[%s1265_s3 + $0x60] sm:$0xff] }
  0x3c   :  { %257 = vst [vmem:[%s1271_s9 + $0xd8] sm:$0xff] %v241_v35  ;;  %v218_v56 = vmul.f32 %v795_v10, %v870_v47 }
  0x43   :  { %v89_v52 = vld [vmem:[%s1265_s3 + $0x70] sm:$0xff]  ;;  %v885_v53 = vld [vmem:[%s1265_s3 + $0x68] sm:$0xff]  ;;  %v890_v54 = vld [vmem:[%s1265_s3 + $0x78] sm:$0xff] }
  0x44   :  { %254 = vst [vmem:[%s1271_s9 + $0xa8] sm:$0xff] %v238_v44  ;;  %v202_v57 = vmul.f32 %v780_v3, %v885_v53  ;;  %v219_v61 = vmul.f32 %v795_v10, %v89_v52  ;;  %v203_v62 = vmul.f32 %v780_v3, %v890_v54  ;;  %v117_v2 = vpack.c.bf16 %v89_v52, %v870_v47 }
  0x45   :  { %v118_v4 = vpack.c.bf16 %v890_v54, %v885_v53 }
  0x46   :  { %v234_v17 = vadd.f32 %v218_v56, %v202_v57  ;;  %v235_v21 = vadd.f32 %v219_v61, %v203_v62 }
  0x4b   :  { %v902_v58 = vld [vmem:[%s1265_s3 + $0x40] sm:$0xff]  ;;  %v907_v59 = vld [vmem:[%s1265_s3 + $0x50] sm:$0xff] }
  0x4c   :  { %255 = vst [vmem:[%s1271_s9 + $0xb8] sm:$0xff] %v239_v45  ;;  %v216_v9 = vmul.f32 %v795_v10, %v902_v58  ;;  %v217_v11 = vmul.f32 %v795_v10, %v907_v59  ;;  %v115_v18 = vpack.c.bf16 %v907_v59, %v902_v58 }
  0x53   :  { %v918_v63 = vld [vmem:[%s1265_s3 + $0x48] sm:$0xff] }
  0x54   :  { %188 = vst [vmem:[%s1271_s9 + $0x80] sm:$0xff] %v91_v33  ;;  %v200_v12 = vmul.f32 %v780_v3, %v918_v63 }
  0x56   :  { %v232_v31 = vadd.f32 %v216_v9, %v200_v12 }
  0x5b   :  { %v935_v5 = vld [vmem:[%s1265_s3 + $0x58] sm:$0xff]  ;;  %v940_v6 = vld [vmem:[%s1265_s3 + $0x20] sm:$0xff] }
  0x5c   :  { %189 = vst [vmem:[%s1271_s9 + $0x90] sm:$0xff] %v93_v38  ;;  %v201_v13 = vmul.f32 %v780_v3, %v935_v5  ;;  %v214_v22 = vmul.f32 %v795_v10, %v940_v6  ;;  %v116_v26 = vpack.c.bf16 %v935_v5, %v918_v63 }
  0x5e   :  { %v233_v32 = vadd.f32 %v217_v11, %v201_v13 }
  0x63   :  { %v960_v14 = vld [vmem:[%s1265_s3 + $0x30] sm:$0xff]  ;;  %v965_v15 = vld [vmem:[%s1265_s3 + $0x28] sm:$0xff]  ;;  %v970_v16 = vld [vmem:[%s1265_s3 + $0x38] sm:$0xff] }
  0x64   :  { %252 = vst [vmem:[%s1271_s9 + $0x88] sm:$0xff] %v236_v55  ;;  %v198_v23 = vmul.f32 %v780_v3, %v965_v15  ;;  %v113_v27 = vpack.c.bf16 %v960_v14, %v940_v6  ;;  %v215_v28 = vmul.f32 %v795_v10, %v960_v14  ;;  %v114_v29 = vpack.c.bf16 %v970_v16, %v965_v15 }
  0x65   :  { %253 = vst [vmem:[%s1271_s9 + $0x98] sm:$0xff] %v237_v60  ;;  %v199_v33 = vmul.f32 %v780_v3, %v970_v16 }
  0x66   :  { %186 = vst [vmem:[%s1271_s9 + $0x60] sm:$0xff] %v870_v47 }
  0x6d   :  { %v1002_v30 = vld [vmem:[%s1265_s3] sm:$0xff] }
  0x6e   :  { %187 = vst [vmem:[%s1271_s9 + $0x70] sm:$0xff] %v89_v52  ;;  %v212_v36 = vmul.f32 %v795_v10, %v1002_v30 }
  0x75   :  { %v1012_v35 = vld [vmem:[%s1265_s3 + $0x10] sm:$0xff] }
  0x76   :  { %16 = vsyncpa [#allocation4], 0  ;;  %147 = vmatpush.bf16.msra.mxu0 %v117_v2  ;;  %250 = vst [vmem:[%s1271_s9 + $0x68] sm:$0xff] %v234_v17  ;;  %v213_v37 = vmul.f32 %v795_v10, %v1012_v35  ;;  %v41_v39 = vadd.f32 %v40_v19, %v36_v0  ;;  %v47_v40 = vadd.f32 %v46_v20, %v37_v1  ;;  %v58_v41 = vrot.slane %v39_v24, 4  ;;  %v277_v42 = vld [vmem:[%s1266_s4 + $0x70] sm:$0xff]  ;;  %v278_v43 = vld [vmem:[%s1266_s4 + $0x78] sm:$0xff] }
  0x77   :  { %160 = vmatpush.bf16.msra.mxu1 %v118_v4  ;;  %v230_v44 = vadd.f32 %v214_v22, %v198_v23  ;;  %v53_v46 = vadd.f32 %v52_v25, %v38_v7  ;;  %v67_v51 = vmul.f32 %v842_v34, %v66_v8  ;;  %v275_v52 = vld [vmem:[%s1266_s4 + $0x60] sm:$0xff]  ;;  %v276_v53 = vld [vmem:[%s1266_s4 + $0x68] sm:$0xff]  ;;  %vm69_vm0 = vweird.f32 %v842_v34  ;;  %v273_v4 = vld [vmem:[%s1266_s4 + $0x50] sm:$0xff]  ;;  %s646_s11 = sshll.u32 %s1270_s8, 4  ;;  %s714_s14 = smov [#allocation3]   ;;  %s647_s11 = int_to_ptr.hbm [resolvable:$true] %s646_s11 }
  0x78   :  { %v42_v48 = vrot.slane %v41_v39, 2  ;;  %v48_v49 = vrot.slane %v47_v40, 2  ;;  %v59_v50 = vadd.f32 %v58_v41, %v39_v24  ;;  %v286_v56 = vpack.c.bf16 %v278_v43, %v277_v42  ;;  %v274_v5 = vld [vmem:[%s1266_s4 + $0x58] sm:$0xff]  ;;  %v271_v15 = vld [vmem:[%s1266_s4 + $0x40] sm:$0xff]  ;;  %v272_v16 = vld [vmem:[%s1266_s4 + $0x48] sm:$0xff] }
  0x79   :  { %v54_v55 = vrot.slane %v53_v46, 2  ;;  %v68_v61 = vadd.f32 %v842_v34, %v67_v51  ;;  %v285_v63 = vpack.c.bf16 %v276_v53, %v275_v52  ;;  %v111_v7 = vpack.c.bf16 %v1012_v35, %v1002_v30  ;;  %v267_v41 = vld [vmem:[%s1266_s4 + $0x20] sm:$0xff]  ;;  %v268_v42 = vld [vmem:[%s1266_s4 + $0x28] sm:$0xff] }
  0x7a   :  { %148 = vmatpush.bf16.msra.mxu0 %v115_v18  ;;  %v43_v57 = vadd.f32 %v42_v48, %v41_v39  ;;  %v60_v60 = vrot.slane %v59_v50, 2  ;;  %287 = vmatpush.bf16.msra.mxu2 %v286_v56  ;;  %vm135_vm1 = vcmask 1041409   ;;  %vm137_vm2 = vcmask 1042434   ;;  %v264_v48 = vld [vmem:[%s1266_s4 + $0x8] sm:$0xff] }
  0x7b   :  { %161 = vmatpush.bf16.msra.mxu1 %v116_v26  ;;  %v55_v62 = vadd.f32 %v54_v55, %v53_v46  ;;  %v70_v9 = vsel %vm69_vm0, %v842_v34, %v68_v61  ;;  %v284_v34 = vpack.c.bf16 %v274_v5, %v273_v4  ;;  %vm139_vm3 = vcmask 1043459   ;;  %v408_v4 = vld [vmem:[%s1269_s7 + $0x78] sm:$0xff] }
  0x7c   :  { %v44_v0 = vrot.slane %v43_v57, 1  ;;  %v61_v2 = vadd.f32 %v60_v60, %v59_v50  ;;  %v281_v43 = vpack.c.bf16 %v268_v42, %v267_v41  ;;  %v670_v50 = vld [vmem:[%s1264_s2] ss:$0 sm:$0xff]  ;;  %vm300_vm4 = vcmask 1041408   ;;  %v399_v41 = vld [vmem:[%s1269_s7 + $0x30] sm:$0xff]  ;;  %v400_v42 = vld [vmem:[%s1269_s7 + $0x38] sm:$0xff] }
  0x7d   :  { %v1024_v38 = vld [vmem:[%s1265_s3 + $0x8] sm:$0xff]  ;;  %v56_v8 = vrot.slane %v55_v62, 1  ;;  %vm509_vm5 = vcmask 1043456  }
  0x7e   :  { %251 = vst [vmem:[%s1271_s9 + $0x78] sm:$0xff] %v235_v21  ;;  %v196_v45 = vmul.f32 %v780_v3, %v1024_v38  ;;  %149 = vmatpush.bf16.msra.mxu0 %v113_v27  ;;  %v45_v12 = vadd.f32 %v44_v0, %v43_v57  ;;  %v62_v17 = vrot.slane %v61_v2, 1  ;;  %288 = vmatpush.bf16.msra.mxu2 %v285_v63 }
  0x7f   :  { %184 = vst [vmem:[%s1271_s9 + $0x40] sm:$0xff] %v902_v58  ;;  %v49_v58 = vadd.f32 %v48_v49, %v47_v40  ;;  %162 = vmatpush.bf16.msra.mxu1 %v114_v29  ;;  %v57_v18 = vadd.f32 %v56_v8, %v55_v62  ;;  %v283_v27 = vpack.c.bf16 %v272_v16, %v271_v15 }
  0x80   :  { %v228_v11 = vadd.f32 %v212_v36, %v196_v45  ;;  %v63_v19 = vadd.f32 %v62_v17, %v61_v2  ;;  %v71_v20 = vmul.f32 %v70_v9, %v45_v12  ;;  %v266_v45 = vld [vmem:[%s1266_s4 + $0x18] sm:$0xff]  ;;  %v407_v2 = vld [vmem:[%s1269_s7 + $0x70] sm:$0xff] }
  0x81   :  { %v50_v1 = vrot.slane %v49_v58, 1  ;;  %v73_v22 = vmul.f32 %v70_v9, %v57_v18  ;;  %v416_v5 = vpack.c.bf16 %v408_v4, %v407_v2  ;;  %v403_v17 = vld [vmem:[%s1269_s7 + $0x50] sm:$0xff] }
  0x82   :  { %150 = vmatpush.bf16.msra.mxu0 %v111_v7  ;;  %v74_v23 = vmul.f32 %v70_v9, %v63_v19  ;;  %v107_v24 = vpack.c.bf16 %v71_v20, %v71_v20  ;;  %289 = vmatpush.bf16.msra.mxu2 %v284_v34  ;;  %v395_v2 = vld [vmem:[%s1269_s7 + $0x10] sm:$0xff] }
  0x83   :  { %v51_v13 = vadd.f32 %v50_v1, %v49_v58  ;;  %v109_v26 = vpack.c.bf16 %v73_v22, %v73_v22  ;;  %417 = vmatpush.bf16.msra.mxu3 %v416_v5 }
  0x84   :  { %v131_v29 = vunpack.c.l.b16 %v107_v24  ;;  %v401_v24 = vld [vmem:[%s1269_s7 + $0x40] sm:$0xff] }
  0x85   :  { %v72_v21 = vmul.f32 %v70_v9, %v51_v13  ;;  %v405_v9 = vld [vmem:[%s1269_s7 + $0x60] sm:$0xff] }
  0x86   :  { %v78_v47 = vld [vmem:[%s1265_s3 + $0x18] sm:$0xff]  ;;  %290 = vmatpush.bf16.msra.mxu2 %v283_v27 }
  0x87   :  { %185 = vst [vmem:[%s1271_s9 + $0x50] sm:$0xff] %v907_v59  ;;  %v197_v54 = vmul.f32 %v780_v3, %v78_v47  ;;  %v231_v59 = vadd.f32 %v215_v28, %v199_v33  ;;  %v108_v25 = vpack.c.bf16 %v72_v21, %v72_v21  ;;  %v110_v28 = vpack.c.bf16 %v74_v23, %v74_v23  ;;  %v270_v33 = vld [vmem:[%s1266_s4 + $0x38] sm:$0xff] }
  0x88   :  { %248 = vst [vmem:[%s1271_s9 + $0x48] sm:$0xff] %v232_v31  ;;  %v133_v31 = vunpack.c.l.b16 %v109_v26 }
  0x89   :  { %249 = vst [vmem:[%s1271_s9 + $0x58] sm:$0xff] %v233_v32  ;;  %v269_v32 = vld [vmem:[%s1266_s4 + $0x30] sm:$0xff] }
  0x8a   :  { %182 = vst [vmem:[%s1271_s9 + $0x20] sm:$0xff] %v940_v6  ;;  %v112_v6 = vpack.c.bf16 %v78_v47, %v1024_v38  ;;  %v282_v39 = vpack.c.bf16 %v270_v33, %v269_v32  ;;  %v263_v47 = vld [vmem:[%s1266_s4] sm:$0xff] }
  0x8b   :  { %183 = vst [vmem:[%s1271_s9 + $0x30] sm:$0xff] %v960_v14  ;;  %v229_v14 = vadd.f32 %v213_v37, %v197_v54  ;;  %v279_v49 = vpack.c.bf16 %v264_v48, %v263_v47 }
  0x8c   :  { %246 = vst [vmem:[%s1271_s9 + $0x28] sm:$0xff] %v230_v44  ;;  %163 = vmatpush.bf16.msra.mxu1 %v112_v6  ;;  %291 = vmatpush.bf16.msra.mxu2 %v282_v39  ;;  %v265_v44 = vld [vmem:[%s1266_s4 + $0x10] sm:$0xff] }
  0x8d   :  { %247 = vst [vmem:[%s1271_s9 + $0x38] sm:$0xff] %v231_v59  ;;  %v280_v46 = vpack.c.bf16 %v266_v45, %v265_v44  ;;  %v412_v44 = vpack.c.bf16 %v400_v42, %v399_v41 }
  0x8e   :  { %180 = vst [vmem:[%s1271_s9] sm:$0xff] %v1002_v30  ;;  %v132_v30 = vunpack.c.l.b16 %v108_v25  ;;  %v402_v25 = vld [vmem:[%s1269_s7 + $0x48] sm:$0xff] }
  0x8f   :  { %181 = vst [vmem:[%s1271_s9 + $0x10] sm:$0xff] %v1012_v35  ;;  %v134_v35 = vunpack.c.l.b16 %v110_v28 }
  0x90   :  { %244 = vst [vmem:[%s1271_s9 + $0x8] sm:$0xff] %v228_v11  ;;  %v136_v36 = vsel %vm135_vm1, %v132_v30, %v131_v29  ;;  %292 = vmatpush.bf16.msra.mxu2 %v281_v43  ;;  %v406_v11 = vld [vmem:[%s1269_s7 + $0x68] sm:$0xff]  ;;  %v413_v29 = vpack.c.bf16 %v402_v25, %v401_v24 }
  0x91   :  { %245 = vst [vmem:[%s1271_s9 + $0x18] sm:$0xff] %v229_v14  ;;  %v138_v37 = vsel %vm137_vm2, %v133_v31, %v136_v36  ;;  %v415_v12 = vpack.c.bf16 %v406_v11, %v405_v9  ;;  %v404_v14 = vld [vmem:[%s1269_s7 + $0x58] sm:$0xff] }
  0x92   :  { %v140_v38 = vsel %vm139_vm3, %v134_v35, %v138_v37  ;;  %v414_v18 = vpack.c.bf16 %v404_v14, %v403_v17 }
  0x93   :  { %v141_v40 = vpack.c.b16 %v140_v38, %v140_v38  ;;  %418 = vmatpush.bf16.msra.mxu3 %v415_v12 }
  0x94   :  { %293 = vmatpush.bf16.msra.mxu2 %v280_v46 }
  0x95   :  { %151 = vmatmul.bf16.vlgmr.msra.gmra.mxu0 %v141_v40  ;;  %164 = vmatmul.bf16.vlgmr.msra.gmra.mxu1 %v141_v40 }
  0x97   :  { %419 = vmatpush.bf16.msra.mxu3 %v414_v18 }
  0x98   :  { %294 = vmatpush.bf16.msra.mxu2 %v279_v49 }
  0x9b   :  { %420 = vmatpush.bf16.msra.mxu3 %v413_v29 }
  0x9f   :  { %421 = vmatpush.bf16.msra.mxu3 %v412_v44 }
 0x112   :  { %v152_v51 = vpop.f32.mrf.mxu0  ;;  %v165_v52 = vpop.f32.mrf.mxu1 }
 0x113   :  { %v172_v53 = vadd.f32 %v670_v50, %v152_v51  ;;  %v177_v54 = vmul.f32 %v795_v10, %v152_v51  ;;  %v174_v55 = vmul.f32 %v780_v3, %v165_v52  ;;  %v712_v3 = vmov 2.0  }
 0x114   :  { %675 = vrcp.f32 %v712_v3 }
 0x115   :  { %v178_v56 = vadd.f32 %v177_v54, %v174_v55  ;;  %v262_v57 = vpack.c.bf16 %v172_v53, %v172_v53  ;;  %v397_v55 = vld [vmem:[%s1269_s7 + $0x20] sm:$0xff] }
 0x117   :  { %v179_v58 = vadd.f32 %v670_v50, %v178_v56  ;;  %295 = vmatmul.bf16.vlgmr.msra.gmra.mxu2 %v262_v57  ;;  %v398_v56 = vld [vmem:[%s1269_s7 + $0x28] sm:$0xff] }
 0x119   :  { %v503_v60 = vrot.slane %v179_v58, 2  ;;  %v505_v61 = vrot.slane %v179_v58, 6 }
 0x11a   :  { %v154_v59 = vpop.f32.mrf.mxu0  ;;  %v167_v62 = vpop.f32.mrf.mxu1 }
 0x11b   :  { %v1143_v63 = vsel %vm300_vm4, %v503_v60, %v505_v61  ;;  %v1148_v1 = vpop.eup %675  ;;  %v411_v60 = vpack.c.bf16 %v398_v56, %v397_v55 }
 0x11c   :  { %v525_v0 = vmul.f32 %v1143_v63, %v1143_v63  ;;  %v309_v8 = vmul.f32 2.0, %v1148_v1  ;;  %vm313_vm7 = vweird.f32 %v1148_v1 }
 0x11d   :  { %422 = vmatpush.bf16.msra.mxu3 %v411_v60 }
 0x11e   :  { %v526_v10 = vsel %vm509_vm5, %v525_v0, 0.0  ;;  %v310_v13 = vsub.f32 1.0, %v309_v8  ;;  %v393_v8 = vld [vmem:[%s1269_s7] sm:$0xff] }
 0x11f   :  { %527 = vadd.xlane.f32.xlu0 %v526_v10 }
 0x120   :  { %v311_v21 = vmul.f32 %v1148_v1, %v310_v13 }
 0x122   :  { %v312_v35 = vadd.f32 %v1148_v1, %v311_v21 }
 0x124   :  { %v1204_v57 = vsel %vm313_vm7, %v1148_v1, %v312_v35  ;;  %v396_v1 = vld [vmem:[%s1269_s7 + $0x18] sm:$0xff] }
 0x192   :  { %v528_v7 = vpop.xlane.xlu0 %527 }
 0x193   :  { %v529_v6 = vmax.f32 %v528_v7, 1e-24 }
 0x195   :  { %677 = vrsqrt.f32 %v529_v6  ;;  %vm536_vm8 = vweird.f32 %v529_v6 }
 0x19a   :  { %v1169_v34 = vpop.f32.mrf.mxu2 }
 0x19b   :  { %v678_v19 = vpop.eup %677  ;;  %v301_v20 = vsel %vm300_vm4, %v1169_v34, 0.0  ;;  %v316_v15 = vmul.f32 %v1169_v34, %v1169_v34  ;;  %v351_v16 = vrot.slane %v1169_v34, 2 }
 0x19c   :  { %v531_v22 = vmul.f32 %v678_v19, %v529_v6  ;;  %v302_v23 = vrot.slane %v301_v20, 4  ;;  %vm537_vm6 = vweird.f32 %v678_v19  ;;  %v410_v6 = vpack.c.bf16 %v396_v1, %v395_v2 }
 0x19d   :  { %v317_v26 = vsel %vm300_vm4, %v316_v15, 0.0  ;;  %v353_v27 = vsel %vm300_vm4, %v351_v16, 0.0  ;;  %v362_v28 = vrot.slane %v316_v15, 2  ;;  %vm538_vm9 = vmor %vm536_vm8, %vm537_vm6 }
 0x19e   :  { %v532_v30 = vmul.f32 %v678_v19, %v531_v22  ;;  %v303_v31 = vadd.f32 %v302_v23, %v301_v20  ;;  %v318_v32 = vrot.slane %v317_v26, 4  ;;  %v354_v33 = vrot.slane %v353_v27, 4  ;;  %423 = vmatpush.bf16.msra.mxu3 %v410_v6 }
 0x19f   :  { %v364_v36 = vsel %vm300_vm4, %v362_v28, 0.0 }
 0x1a0   :  { %v533_v37 = vmul.f32 0.5, %v532_v30  ;;  %v304_v38 = vrot.slane %v303_v31, 2  ;;  %v319_v39 = vadd.f32 %v318_v32, %v317_v26  ;;  %v355_v40 = vadd.f32 %v354_v33, %v353_v27 }
 0x1a1   :  { %v365_v43 = vrot.slane %v364_v36, 4 }
 0x1a2   :  { %v534_v45 = vsub.f32 1.5, %v533_v37  ;;  %v305_v46 = vadd.f32 %v304_v38, %v303_v31  ;;  %v320_v47 = vrot.slane %v319_v39, 2  ;;  %v356_v48 = vrot.slane %v355_v40, 2  ;;  %v298_v49 = vpop.f32.mrf.mxu2  ;;  %v671_v38 = vld [vmem:[%s1267_s5] ss:$0 sm:$0xff]  ;;  %s713_s5 = smov 126  }
 0x1a3   :  { %v366_v50 = vadd.f32 %v365_v43, %v364_v36  ;;  %v672_v43 = vld [vmem:[%s1268_s6] ss:$0 sm:$0xff] }
 0x1a4   :  { %v306_v51 = vrot.slane %v305_v46, 1  ;;  %v321_v52 = vadd.f32 %v320_v47, %v319_v39  ;;  %v357_v53 = vadd.f32 %v356_v48, %v355_v40  ;;  %v535_v54 = vmul.f32 %v678_v19, %v534_v45 }
 0x1a5   :  { %v367_v58 = vrot.slane %v366_v50, 2 }
 0x1a6   :  { %v307_v61 = vadd.f32 %v306_v51, %v305_v46  ;;  %v322_v59 = vrot.slane %v321_v52, 1  ;;  %v358_v62 = vrot.slane %v357_v53, 1  ;;  %v539_v0 = vsel %vm538_vm9, %v678_v19, %v535_v54 }
 0x1a7   :  { %v368_v10 = vadd.f32 %v367_v58, %v366_v50  ;;  %v1207_v3 = vmul.f32 %v539_v0, %v1143_v63  ;;  %v394_v63 = vld [vmem:[%s1269_s7 + $0x8] sm:$0xff] }
 0x1a8   :  { %v315_v4 = vmul.f32 %v1204_v57, %v307_v61  ;;  %v323_v5 = vadd.f32 %v322_v59, %v321_v52  ;;  %v359_v7 = vadd.f32 %v358_v62, %v357_v53  ;;  %v409_v18 = vpack.c.bf16 %v394_v63, %v393_v8 }
 0x1a9   :  { %v369_v9 = vrot.slane %v368_v10, 1  ;;  %v547_v11 = vpack.c.bf16 %v1207_v3, %v1207_v3 }
 0x1aa   :  { %v324_v12 = vmul.f32 %v323_v5, %v1204_v57  ;;  %v325_v13 = vmul.f32 %v315_v4, %v315_v4  ;;  %v360_v17 = vmul.f32 %v359_v7, %v1204_v57  ;;  %424 = vmatpush.bf16.msra.mxu3 %v409_v18  ;;  %v328_v36 = vsub.f32 %v1169_v34, %v315_v4 }
 0x1ab   :  { %v370_v14 = vadd.f32 %v369_v9, %v368_v10  ;;  %555 = vmatpush.bf16.xpose.msrb.mxu0 %v547_v11 }
 0x1ac   :  { %v326_v19 = vsub.f32 %v324_v12, %v325_v13  ;;  %v372_v20 = vmul.f32 %v360_v17, %v360_v17  ;;  %v375_v42 = vsub.f32 %v1169_v34, %v360_v17 }
 0x1ad   :  { %v371_v21 = vmul.f32 %v370_v14, %v1204_v57 }
 0x1ae   :  { %v327_v15 = vmax.f32 %v326_v19, 0.0 }
 0x1af   :  { %v373_v16 = vsub.f32 %v371_v21, %v372_v20 }
 0x1b0   :  { %v329_v22 = vadd.f32 1e-05, %v327_v15 }
 0x1b1   :  { %v374_v23 = vmax.f32 %v373_v16, 0.0 }
 0x1b2   :  { %679 = vrsqrt.f32 %v329_v22  ;;  %vm336_vm11 = vweird.f32 %v329_v22 }
 0x1b3   :  { %v376_v24 = vadd.f32 1e-05, %v374_v23 }
 0x1b5   :  { %681 = vrsqrt.f32 %v376_v24  ;;  %vm383_vm14 = vweird.f32 %v376_v24 }
 0x1b8   :  { %v680_v25 = vpop.eup %679 }
 0x1b9   :  { %v331_v26 = vmul.f32 %v680_v25, %v329_v22  ;;  %vm337_vm10 = vweird.f32 %v680_v25 }
 0x1ba   :  { %vm338_vm12 = vmor %vm336_vm11, %vm337_vm10  ;;  %vm562_vm11 = vcmask 9216  }
 0x1bb   :  { %v682_v27 = vpop.eup %681  ;;  %v332_v28 = vmul.f32 %v680_v25, %v331_v26 }
 0x1bc   :  { %v378_v29 = vmul.f32 %v682_v27, %v376_v24  ;;  %vm384_vm13 = vweird.f32 %v682_v27 }
 0x1bd   :  { %v333_v30 = vmul.f32 0.5, %v332_v28  ;;  %vm385_vm15 = vmor %vm383_vm14, %vm384_vm13 }
 0x1be   :  { %v379_v31 = vmul.f32 %v682_v27, %v378_v29 }
 0x1bf   :  { %v334_v32 = vsub.f32 1.5, %v333_v30 }
 0x1c0   :  { %v380_v33 = vmul.f32 0.5, %v379_v31 }
 0x1c1   :  { %v335_v35 = vmul.f32 %v680_v25, %v334_v32 }
 0x1c2   :  { %v381_v37 = vsub.f32 1.5, %v380_v33 }
 0x1c3   :  { %v339_v39 = vsel %vm338_vm12, %v680_v25, %v335_v35  ;;  %vm607_vm12 = vcmask 11266  }
 0x1c4   :  { %v340_v40 = vmul.f32 %v339_v39, %v328_v36  ;;  %v382_v41 = vmul.f32 %v682_v27, %v381_v37 }
 0x1c6   :  { %v386_v44 = vsel %vm385_vm15, %v682_v27, %v382_v41  ;;  %v344_v45 = vmul.f32 %v671_v38, %v340_v40 }
 0x1c7   :  { %v387_v46 = vmul.f32 %v386_v44, %v375_v42 }
 0x1c8   :  { %v348_v47 = vadd.f32 %v672_v43, %v344_v45 }
 0x1c9   :  { %v388_v48 = vmul.f32 %v671_v38, %v387_v46 }
 0x1ca   :  { %v349_v50 = vmax.f32 %v348_v47, 0.0 }
 0x1cb   :  { %v389_v49 = vadd.f32 %v672_v43, %v388_v48 }
 0x1cd   :  { %v390_v51 = vmax.f32 %v389_v49, 0.0 }
 0x1cf   :  { %v391_v52 = vsel %vm300_vm4, %v349_v50, %v390_v51 }
 0x1d0   :  { %v392_v53 = vpack.c.bf16 %v391_v52, %v391_v52 }
 0x1d2   :  { %425 = vmatmul.bf16.vlgmr.msra.gmra.mxu3 %v392_v53 }
 0x255   :  { %v1236_v54 = vpop.f32.mrf.mxu3 }
 0x256   :  { %v430_v34 = vsel %vm300_vm4, %v1236_v54, 0.0  ;;  %v438_v55 = vmul.f32 %v1236_v54, %v1236_v54  ;;  %v464_v56 = vrot.slane %v1236_v54, 2 }
 0x257   :  { %v431_v58 = vrot.slane %v430_v34, 4 }
 0x258   :  { %v439_v60 = vsel %vm300_vm4, %v438_v55, 0.0  ;;  %v466_v61 = vsel %vm300_vm4, %v464_v56, 0.0  ;;  %v475_v59 = vrot.slane %v438_v55, 2 }
 0x259   :  { %v432_v62 = vadd.f32 %v431_v58, %v430_v34  ;;  %v440_v0 = vrot.slane %v439_v60, 4  ;;  %v467_v10 = vrot.slane %v466_v61, 4 }
 0x25a   :  { %v477_v2 = vsel %vm300_vm4, %v475_v59, 0.0 }
 0x25b   :  { %v433_v1 = vrot.slane %v432_v62, 2  ;;  %v441_v4 = vadd.f32 %v440_v0, %v439_v60  ;;  %v468_v5 = vadd.f32 %v467_v10, %v466_v61  ;;  %v478_v7 = vrot.slane %v477_v2, 4 }
 0x25d   :  { %v434_v6 = vadd.f32 %v433_v1, %v432_v62  ;;  %v442_v8 = vrot.slane %v441_v4, 2  ;;  %v469_v63 = vrot.slane %v468_v5, 2  ;;  %v479_v9 = vadd.f32 %v478_v7, %v477_v2  ;;  %v428_v11 = vpop.f32.mrf.mxu3 }
 0x25f   :  { %v435_v12 = vrot.slane %v434_v6, 1  ;;  %v443_v13 = vadd.f32 %v442_v8, %v441_v4  ;;  %v470_v17 = vadd.f32 %v469_v63, %v468_v5  ;;  %v480_v14 = vrot.slane %v479_v9, 2 }
 0x261   :  { %v436_v18 = vadd.f32 %v435_v12, %v434_v6  ;;  %v444_v19 = vrot.slane %v443_v13, 1  ;;  %v471_v20 = vrot.slane %v470_v17, 1  ;;  %v481_v21 = vadd.f32 %v480_v14, %v479_v9 }
 0x263   :  { %v437_v15 = vmul.f32 %v436_v18, %v1204_v57  ;;  %v445_v16 = vadd.f32 %v444_v19, %v443_v13  ;;  %v472_v22 = vadd.f32 %v471_v20, %v470_v17  ;;  %v482_v23 = vrot.slane %v481_v21, 1 }
 0x265   :  { %v446_v24 = vmul.f32 %v445_v16, %v1204_v57  ;;  %v447_v25 = vmul.f32 %v437_v15, %v437_v15  ;;  %v473_v26 = vmul.f32 %v472_v22, %v1204_v57  ;;  %v483_v27 = vadd.f32 %v482_v23, %v481_v21 }
 0x266   :  { %v450_v50 = vsub.f32 %v1236_v54, %v437_v15 }
 0x267   :  { %v448_v28 = vsub.f32 %v446_v24, %v447_v25  ;;  %v485_v29 = vmul.f32 %v473_v26, %v473_v26  ;;  %v484_v30 = vmul.f32 %v483_v27, %v1204_v57  ;;  %v488_v51 = vsub.f32 %v1236_v54, %v473_v26 }
 0x269   :  { %v449_v31 = vmax.f32 %v448_v28, 0.0  ;;  %v486_v32 = vsub.f32 %v484_v30, %v485_v29 }
 0x26b   :  { %v451_v33 = vadd.f32 1e-05, %v449_v31  ;;  %v487_v35 = vmax.f32 %v486_v32, 0.0 }
 0x26d   :  { %683 = vrsqrt.f32 %v451_v33  ;;  %v489_v36 = vadd.f32 1e-05, %v487_v35  ;;  %vm458_vm1 = vweird.f32 %v451_v33 }
 0x26f   :  { %685 = vrsqrt.f32 %v489_v36  ;;  %vm496_vm6 = vweird.f32 %v489_v36 }
 0x273   :  { %v684_v37 = vpop.eup %683 }
 0x274   :  { %v453_v38 = vmul.f32 %v684_v37, %v451_v33  ;;  %vm459_vm0 = vweird.f32 %v684_v37 }
 0x275   :  { %v686_v39 = vpop.eup %685  ;;  %vm460_vm3 = vmor %vm458_vm1, %vm459_vm0 }
 0x276   :  { %v454_v40 = vmul.f32 %v684_v37, %v453_v38  ;;  %v491_v41 = vmul.f32 %v686_v39, %v489_v36  ;;  %vm497_vm2 = vweird.f32 %v686_v39 }
 0x277   :  { %vm498_vm7 = vmor %vm496_vm6, %vm497_vm2 }
 0x278   :  { %v455_v42 = vmul.f32 0.5, %v454_v40  ;;  %v492_v43 = vmul.f32 %v686_v39, %v491_v41 }
 0x27a   :  { %v456_v44 = vsub.f32 1.5, %v455_v42  ;;  %v493_v45 = vmul.f32 0.5, %v492_v43 }
 0x27c   :  { %v457_v46 = vmul.f32 %v684_v37, %v456_v44  ;;  %v494_v47 = vsub.f32 1.5, %v493_v45 }
 0x27e   :  { %v461_v48 = vsel %vm460_vm3, %v684_v37, %v457_v46  ;;  %v495_v49 = vmul.f32 %v686_v39, %v494_v47 }
 0x27f   :  { %v462_v53 = vmul.f32 %v461_v48, %v450_v50 }
 0x280   :  { %v499_v52 = vsel %vm498_vm7, %v686_v39, %v495_v49 }
 0x281   :  { %v500_v34 = vmul.f32 %v499_v52, %v488_v51 }
 0x283   :  { %v501_v55 = vsel %vm300_vm4, %v462_v53, %v500_v34  ;;  %vm596_vm4 = vcmask 27666  }
 0x284   :  { %v508_v56 = vmul.f32 %v501_v55, %v501_v55 }
 0x286   :  { %v510_v58 = vsel %vm509_vm5, %v508_v56, 0.0 }
 0x287   :  { %511 = vadd.xlane.f32.xlu0 %v510_v58 }
 0x2fa   :  { %v512_v60 = vpop.xlane.xlu0 %511 }
 0x2fb   :  { %v513_v61 = vmax.f32 %v512_v60, 1e-24 }
 0x2fd   :  { %687 = vrsqrt.f32 %v513_v61  ;;  %vm520_vm9 = vweird.f32 %v513_v61 }
 0x303   :  { %v688_v59 = vpop.eup %687 }
 0x304   :  { %v515_v62 = vmul.f32 %v688_v59, %v513_v61  ;;  %vm521_vm8 = vweird.f32 %v688_v59 }
 0x305   :  { %vm522_vm10 = vmor %vm520_vm9, %vm521_vm8 }
 0x306   :  { %v516_v0 = vmul.f32 %v688_v59, %v515_v62 }
 0x308   :  { %v517_v10 = vmul.f32 0.5, %v516_v0 }
 0x30a   :  { %v518_v2 = vsub.f32 1.5, %v517_v10 }
 0x30c   :  { %v519_v54 = vmul.f32 %v688_v59, %v518_v2 }
 0x30e   :  { %v523_v1 = vsel %vm522_vm10, %v688_v59, %v519_v54 }
 0x30f   :  { %v524_v4 = vmul.f32 %v523_v1, %v501_v55 }
 0x311   :  { %v546_v5 = vpack.c.bf16 %v524_v4, %v524_v4  ;;  %v541_v11 = vmul.f32 %v1207_v3, %v524_v4 }
 0x313   :  { %556 = vmatmul.bf16.vlgmr.msrb.gmra.mxu0 %v546_v5  ;;  %v542_v12 = vsel %vm509_vm5, %v541_v11, 0.0  ;;  %vm576_vm5 = vcmask 1024  }
 0x390   :  { %v557_v7 = vpop.f32.mrf.mxu0 }
 0x391   :  { %v561_v6 = vmul.f32 5.0, %v557_v7 }
 0x393   :  { %v597_v8 = vsel %vm596_vm4, %v561_v6, -inf  ;;  %v563_v9 = vsel %vm562_vm11, %v561_v6, -inf }
 0x394   :  { %598 = vmax.xlane.f32.xlu1 %v597_v8 }
 0x398   :  { %v559_v63 = vpop.f32.mrf.mxu0 }
 0x39c   :  { %564 = vmax.xlane.f32.xlu1 %v563_v9 }
 0x3a4   :  { %543 = vadd.xlane.f32.xlu1 %v542_v12 }
 0x407   :  { %v599_v13 = vpop.xlane.xlu1 %598 }
 0x408   :  { %v600_v17 = vsub.f32 %v561_v6, %v599_v13 }
 0x40a   :  { %v601_v14 = vmul.f32 1.442695, %v600_v17 }
 0x40c   :  { %689 = vpow2.f32 %v601_v14 }
 0x40f   :  { %v565_v18 = vpop.xlane.xlu1 %564 }
 0x410   :  { %v566_v19 = vsub.f32 %v561_v6, %v565_v18 }
 0x412   :  { %v690_v20 = vpop.eup %689  ;;  %v567_v21 = vmul.f32 1.442695, %v566_v19 }
 0x413   :  { %604 = vrot.lane.b32.xlu2 %v690_v20, %s713_s5 }
 0x414   :  { %691 = vpow2.f32 %v567_v21 }
 0x417   :  { %v544_v25 = vpop.xlane.xlu1 %543 }
 0x418   :  { %v545_v27 = vmul.f32 5.0, %v544_v25 }
 0x41a   :  { %v692_v15 = vpop.eup %691 }
 0x41b   :  { %v569_v16 = vsel %vm562_vm11, %v692_v15, 0.0 }
 0x41c   :  { %570 = vadd.xlane.f32.xlu0 %v569_v16 }
 0x46d   :  { %v605_v3 = vpop.permute.xlu2 %604 }
 0x46e   :  { %v608_v22 = vsel %vm607_vm12, %v605_v3, 0.0 }
 0x46f   :  { %609 = vadd.xlane.f32.xlu2 %v608_v22 }
 0x48f   :  { %v571_v23 = vpop.xlane.xlu0 %570 }
 0x490   :  { %693 = vlog2.f32 %v571_v23 }
 0x496   :  { %v694_v24 = vpop.eup %693 }
 0x497   :  { %v573_v26 = vmul.f32 0.6931472, %v694_v24 }
 0x499   :  { %v574_v28 = vadd.f32 %v573_v26, %v565_v18 }
 0x49b   :  { %v575_v29 = vsub.f32 %v574_v28, %v545_v27 }
 0x49d   :  { %v577_v30 = vsel %vm576_vm5, %v575_v29, 0.0 }
 0x49e   :  { %578 = vadd.xlane.f32.xlu0 %v577_v30 }
 0x4e2   :  { %v610_v31 = vpop.xlane.xlu2 %609 }
 0x4e3   :  { %695 = vlog2.f32 %v610_v31 }
 0x4e9   :  { %v696_v32 = vpop.eup %695 }
 0x4ea   :  { %v612_v33 = vmul.f32 0.6931472, %v696_v32 }
 0x4ec   :  { %v613_v35 = vadd.f32 %v612_v33, %v599_v13 }
 0x4ee   :  { %v614_v36 = vsub.f32 %v613_v35, %v545_v27 }
 0x4f0   :  { %v616_v37 = vrot.slane %v614_v36, 2 }
 0x4f2   :  { %v618_v38 = vsel %vm576_vm5, %v616_v37, 0.0 }
 0x4f3   :  { %619 = vadd.xlane.f32.xlu1 %v618_v38 }
 0x511   :  { %v579_v39 = vpop.xlane.xlu0 %578 }
 0x512   :  { %v580_v40 = vrot.slane %v579_v39, 4 }
 0x514   :  { %v581_v41 = vadd.f32 %v580_v40, %v579_v39 }
 0x516   :  { %v582_v42 = vrot.slane %v581_v41, 2 }
 0x518   :  { %v583_v43 = vadd.f32 %v582_v42, %v581_v41 }
 0x51a   :  { %v584_v44 = vrot.slane %v583_v43, 1 }
 0x51c   :  { %v585_v45 = vadd.f32 %v584_v44, %v583_v43 }
 0x51e   :  { %660 = vpush %v585_v45 }
 0x51f   :  { %662 = vpush %v1204_v57 }
 0x54f   :  { %s661_s6 = spop %660 }
 0x550   :  { %s663_s0 = spop %662 }
 0x551   :  { %s595_s28 = smul.f32 %s663_s0, %s661_s6 }
 0x566   :  { %v620_v46 = vpop.xlane.xlu1 %619 }
 0x567   :  { %v621_v47 = vrot.slane %v620_v46, 4 }
 0x569   :  { %v622_v48 = vadd.f32 %v621_v47, %v620_v46 }
 0x56b   :  { %v623_v49 = vrot.slane %v622_v48, 2 }
 0x56d   :  { %v624_v50 = vadd.f32 %v623_v49, %v622_v48 }
 0x56f   :  { %v625_v51 = vrot.slane %v624_v50, 1 }
 0x571   :  { %v626_v52 = vadd.f32 %v625_v51, %v624_v50 }
 0x573   :  { %664 = vpush %v626_v52 }
 0x5a4   :  { %s665_s29 = spop %664 }
 0x5a5   :  { %s636_s30 = smul.f32 %s665_s29, %s663_s0 }
 0x5a7   :  { %s637_s12 = sadd.f32 %s636_s30, %s595_s28 }
 0x5a9   :  { %s638_s13 = smul.f32 0.4, %s637_s12 }
 0x5ab   :  { %640 = sst [smem:[#allocation3]] %s638_s13 }
 0x5ac   :  { %649 = dma.smem_to_hbm %s714_s14, 16, %s647_s11, [#allocation4]  }
 0x5ad   :  { %709 = dma.done.wait [#allocation4], 16  }
 0x5ae   :  { %710 = vsyncadd [#allocation4], 4294967280 }
 0x5af   :  { %658 = sfence }
 0x5b0   :  { %659 = vsyncpa [#allocation4], 1 }

</bundles_post_ra>
